<compile_context>
chip_gen: v7x
topology: tpu7x:2x2x1
jax: 0.10.0
libtpu: 0.0.40
codegen_flags: <defaults>
</compile_context>

<pallas_src>
import math
import functools

import jax
import jax.numpy as jnp
from jax.experimental import pallas as pl
from jax.experimental.pallas import tpu as pltpu


def build_pe_table(max_len: int, d_model: int) -> jnp.ndarray:
    """Deterministic sin/cos positional-encoding table, matching the PyTorch init."""
    position = jnp.arange(max_len, dtype=jnp.float32)[:, None]                  # [max_len, 1]
    div_term = jnp.exp(jnp.arange(0, d_model, 2, dtype=jnp.float32)
                       * (-math.log(10000.0) / d_model))                        # [d_model//2]
    pe = jnp.zeros((max_len, d_model), dtype=jnp.float32)
    pe = pe.at[:, 0::2].set(jnp.sin(position * div_term))
    pe = pe.at[:, 1::2].set(jnp.cos(position * div_term))
    return pe


# ----------------------------- kernels ---------------------------------------

def _add_pe_kernel(x_ref, pe_ref, o_ref):
    # x_ref, pe_ref, o_ref: (tS, D) tiles (batch dim squeezed out of the block).
    o_ref[...] = (x_ref[...] + pe_ref[...]).astype(o_ref.dtype)


def _add_pe_dropout_kernel(x_ref, pe_ref, bits_ref, o_ref, *, threshold: int, scale: float):
    # Inverted dropout: keep with prob (1-p); kept values scaled by 1/(1-p).
    # bits_ref holds uniform int32 bits; drop iff bits < threshold (P = p).
    y = x_ref[...] + pe_ref[...]                         # f32 (pe is f32)
    keep = bits_ref[...] >= jnp.int32(threshold)
    o_ref[...] = jnp.where(keep, y * jnp.float32(scale), jnp.float32(0.0)).astype(o_ref.dtype)


# ----------------------------- wrapper ----------------------------------------

def _pick_seq_tile(S: int, D: int, itemsize: int, target_bytes: int = 2 * 1024 * 1024) -> int:
    """Largest sequence tile dividing S (multiple of 8, or S itself) whose
    (tS, D) block stays within ~target_bytes of VMEM."""
    cands = [t for t in range(1, S + 1) if S % t == 0 and (t % 8 == 0 or t == S)]
    fitting = [t for t in cands if t * D * itemsize <= target_bytes]
    return max(fitting) if fitting else min(cands)


def positional_encoding(x: jnp.ndarray,
                        pe_table: jnp.ndarray,
                        *,
                        p: float = 0.1,
                        apply_dropout: bool = True,
                        rng_key=None) -> jnp.ndarray:
    """x: [B, S, D]; pe_table: [max_len, D] float32. Returns [B, S, D] in x.dtype."""
    B, S, D = x.shape
    pe = pe_table[:S].astype(jnp.float32)                # [S, D], static slice (glue)

    itemsize = jnp.dtype(x.dtype).itemsize
    tS = _pick_seq_tile(S, D, itemsize)
    n_s = S // tS

    # Grid order (s, b): inner batch sweep keeps pe's block index constant,
    # so Pallas skips re-DMA of the pe tile between consecutive steps.
    x_spec = pl.BlockSpec((None, tS, D), lambda s, b: (b, s, 0))
    pe_spec = pl.BlockSpec((tS, D), lambda s, b: (s, 0))
    out_spec = pl.BlockSpec((None, tS, D), lambda s, b: (b, s, 0))

    use_dropout = apply_dropout and p > 0.0
    bytes_accessed = 2 * B * S * D * itemsize + S * D * 4
    if use_dropout:
        bytes_accessed += B * S * D * 4
    cost = pl.CostEstimate(flops=2 * B * S * D, transcendentals=0,
                           bytes_accessed=bytes_accessed)
    compiler_params = pltpu.CompilerParams(
        dimension_semantics=("parallel", "arbitrary"))

    if not use_dropout:
        return pl.pallas_call(
            _add_pe_kernel,
            out_shape=jax.ShapeDtypeStruct((B, S, D), x.dtype),
            grid=(n_s, B),
            in_specs=[x_spec, pe_spec],
            out_specs=out_spec,
            compiler_params=compiler_params,
            cost_estimate=cost,
        )(x, pe)

    if not (0.0 <= p < 1.0):
        raise ValueError("dropout probability must be in [0, 1)")
    if rng_key is None:
        rng_key = jax.random.PRNGKey(0)

    # Uniform 32-bit random words, viewed as int32 so the in-kernel compare is a
    # plain signed integer threshold test (one VPU op per vreg).
    bits_u32 = jax.random.bits(rng_key, (B, S, D), dtype=jnp.uint32)
    bits = jax.lax.bitcast_convert_type(bits_u32, jnp.int32)
    threshold = int(round(p * (1 << 32))) - (1 << 31)    # signed-space threshold
    scale = 1.0 / (1.0 - p)

    kernel = functools.partial(_add_pe_dropout_kernel, threshold=threshold, scale=scale)
    bits_spec = pl.BlockSpec((None, tS, D), lambda s, b: (b, s, 0))

    return pl.pallas_call(
        kernel,
        out_shape=jax.ShapeDtypeStruct((B, S, D), x.dtype),
        grid=(n_s, B),
        in_specs=[x_spec, pe_spec, bits_spec],
        out_specs=out_spec,
        compiler_params=compiler_params,
        cost_estimate=cost,
    )(x, pe, bits)


# ------------------------------- demo ------------------------------------------

if __name__ == "__main__":
    B, S, D = 2, 8, 32
    max_len = 64
    p = 0.1

    key = jax.random.PRNGKey(0)
    kx, kd = jax.random.split(key)
    x = jax.random.normal(kx, (B, S, D), dtype=jnp.float32)
    pe_table = build_pe_table(max_len, D)

    # Training path (dropout active, module default p=0.1).
    out = positional_encoding(x, pe_table, p=p, apply_dropout=True, rng_key=kd)
    out = jax.block_until_ready(out)

    # Eval / deterministic path: must equal x + pe exactly.
    out_eval = positional_encoding(x, pe_table, p=p, apply_dropout=False)
    out_eval = jax.block_until_ready(out_eval)
    ref = x + pe_table[:S][None, :, :]
    assert jnp.allclose(out_eval, ref, atol=1e-6), "mismatch vs reference add"

    # Dropout sanity: every element is either 0 or the scaled (x + pe) value.
    scaled_ref = ref * (1.0 / (1.0 - p))
    is_zero = jnp.isclose(out, 0.0, atol=1e-6)
    is_scaled = jnp.isclose(out, scaled_ref, atol=1e-5, rtol=1e-5)
    assert bool(jnp.all(is_zero | is_scaled)), "dropout output not {0, scaled}"

    print("KERNEL_OK")
</pallas_src>

<mosaic_0001>
module attributes {stable_mosaic.version = 11 : i64} {
  func.func @_add_pe_dropout_kernel(%arg0: i32, %arg1: i32, %arg2: memref<1x8x32xf32, #tpu.memory_space<vmem>>, %arg3: memref<8x32xf32, #tpu.memory_space<vmem>>, %arg4: memref<1x8x32xi32, #tpu.memory_space<vmem>>, %arg5: memref<1x8x32xf32, #tpu.memory_space<vmem>>) attributes {dimension_semantics = [#tpu.dimension_semantics<parallel>, #tpu.dimension_semantics<arbitrary>], iteration_bounds = array<i64: 1, 2>, scalar_prefetch = 0 : i64, scratch_operands = 0 : i64, tpu.core_type = #tpu.core_type<tc>, window_params = [{transform_indices = @transform_0, window_bounds = array<i64: 1, 8, 32>}, {transform_indices = @transform_1, window_bounds = array<i64: 8, 32>}, {transform_indices = @transform_2, window_bounds = array<i64: 1, 8, 32>}, {transform_indices = @transform_3, window_bounds = array<i64: 1, 8, 32>}]} {
    %c0 = arith.constant 0 : index
    %c0_0 = arith.constant 0 : index
    %c0_1 = arith.constant 0 : index
    %0 = vector.load %arg2[%c0, %c0_0, %c0_1] : memref<1x8x32xf32, #tpu.memory_space<vmem>>, vector<1x8x32xf32>
    %1 = vector.shape_cast %0 : vector<1x8x32xf32> to vector<8x32xf32>
    %c0_2 = arith.constant 0 : index
    %c0_3 = arith.constant 0 : index
    %2 = vector.load %arg3[%c0_2, %c0_3] : memref<8x32xf32, #tpu.memory_space<vmem>>, vector<8x32xf32>
    %3 = arith.addf %1, %2 : vector<8x32xf32>
    %c0_4 = arith.constant 0 : index
    %c0_5 = arith.constant 0 : index
    %c0_6 = arith.constant 0 : index
    %4 = vector.load %arg4[%c0_4, %c0_5, %c0_6] : memref<1x8x32xi32, #tpu.memory_space<vmem>>, vector<1x8x32xi32>
    %5 = vector.shape_cast %4 : vector<1x8x32xi32> to vector<8x32xi32>
    %c-1717986918_i32 = arith.constant -1717986918 : i32
    %6 = vector.broadcast %c-1717986918_i32 : i32 to vector<8x32xi32>
    %7 = arith.cmpi sge, %5, %6 : vector<8x32xi32>
    %cst = arith.constant 1.11111116 : f32
    %8 = vector.broadcast %cst : f32 to vector<8x32xf32>
    %9 = arith.mulf %3, %8 : vector<8x32xf32>
    %cst_7 = arith.constant 0.000000e+00 : f32
    %10 = vector.broadcast %cst_7 : f32 to vector<8x32xf32>
    %11 = arith.select %7, %9, %10 : vector<8x32xi1>, vector<8x32xf32>
    %c0_8 = arith.constant 0 : index
    %c0_9 = arith.constant 0 : index
    %c0_10 = arith.constant 0 : index
    %12 = vector.load %arg5[%c0_8, %c0_9, %c0_10] : memref<1x8x32xf32, #tpu.memory_space<vmem>>, vector<1x8x32xf32>
    %13 = vector.shape_cast %12 : vector<1x8x32xf32> to vector<8x32xf32>
    %14 = vector.shape_cast %11 : vector<8x32xf32> to vector<1x8x32xf32>
    tpu.vector_store %arg5[%c0_8, %c0_9, %c0_10], %14 {strides = array<i32>} : memref<1x8x32xf32, #tpu.memory_space<vmem>>, vector<1x8x32xf32>,
    return
  }
  func.func @transform_0(%arg0: i32, %arg1: i32) -> (i32, i32, i32) {
    %c0_i32 = arith.constant 0 : i32
    %c0_i32_0 = arith.constant 0 : i32
    return %arg1, %arg0, %c0_i32 : i32, i32, i32
  }
  func.func @transform_1(%arg0: i32, %arg1: i32) -> (i32, i32) {
    %c0_i32 = arith.constant 0 : i32
    %c0_i32_0 = arith.constant 0 : i32
    return %arg0, %c0_i32 : i32, i32
  }
  func.func @transform_2(%arg0: i32, %arg1: i32) -> (i32, i32, i32) {
    %c0_i32 = arith.constant 0 : i32
    %c0_i32_0 = arith.constant 0 : i32
    return %arg1, %arg0, %c0_i32 : i32, i32, i32
  }
  func.func @transform_3(%arg0: i32, %arg1: i32) -> (i32, i32, i32) {
    %c0_i32 = arith.constant 0 : i32
    %c0_i32_0 = arith.constant 0 : i32
    return %arg1, %arg0, %c0_i32 : i32, i32, i32
  }
}

</mosaic_0001>

<bundles_post_ra>
// kernel: tpu_custom_call.1
= control target key start
LH: loop header
LB: loop body
LE: loop exit
PB: predicated region body
PF: predicated region fallthrough
CT: control target
= control target key end

     0   :  { %8 = vsyncpa [#allocation3], 0  ;;  %s948_s0 = inlined_call_operand.hbm [shape: f32[2,8,32], index: 0, kind: input, shape index: {}]   ;;  %s949_s1 = inlined_call_operand.hbm [shape: f32[8,32], index: 1, kind: input, shape index: {}]   ;;  %s950_s2 = inlined_call_operand.hbm [shape: s32[2,8,32], index: 2, kind: input, shape index: {}]   ;;  %s951_s3 = inlined_call_operand.hbm [shape: f32[2,8,32], index: 3, kind: output, shape index: {}]  }
   0x1   :  { %10 = vsyncpa [#allocation3 + $0x1], 0 }
   0x2   :  { %11 = vsyncpa [#allocation6], 0 }
   0x3   :  { %12 = vsyncpa [#allocation4], 0 }
   0x4   :  { %14 = vsyncpa [#allocation4 + $0x1], 0  ;;  %s697_s12 = smov 0   ;;  %s699_s13 = smov 0  }
   0x5   :  { %s701_s14 = smov 0   ;;  %s703_s15 = smov 0  }
   0x6   :  { %s705_s16 = smov 0   ;;  %s707_s17 = smov 0  }
   0x7 LB: > { %s29_s18 = sadd.s32 1, %s667_s16  ;;  %s41_s19 = sadd.s32 1, %s659_s14  ;;  %s671_s17 = sphi %s707_s17, %s20_s17   ;;  %s667_s16 = sphi %s705_s16, %s977_s16   ;;  %s663_s15 = sphi %s703_s15, %s976_s15   ;;  %s659_s14 = sphi %s701_s14, %s975_s14   ;;  %s655_s13 = sphi %s699_s13, %s974_s13   ;;  %s651_s12 = sphi %s697_s12, %s973_s12  }
   0x8   : > { %p30_p0 = scmp.ge.s32.totalorder %s29_s18, 2  ;;  %p48_p1 = scmp.ne.s32.totalorder %s659_s14, %s655_s13 }
   0x9   : > { %p49_p2 = scmp.eq.s32.totalorder %s671_s17, 0  ;;  %p441_p5 = scmp.lt.s32.totalorder %s671_s17, 2 }
   0xa   : > { %s979_s18 = smov (%p30_p0, %s29_s18), 0  ;;  %s173_s21 = sand.u32 1, %s671_s17  }
   0xb   : > { %p50_p4 = por %p49_p2, %p48_p1  ;;  %s36_s20 = ssub.s32 %s667_s16, %s979_s18 }
   0xc   : > { %p39_p6 = scmp.eq.s32.totalorder %s36_s20, 0  ;;  %s175_s22 = sand.u32 1, %s659_s14  }
   0xd   : > { %s403_s23 = sshll.u32 %s667_s16, 7  ;;  %s747_s25 = sshll.u32 %s175_s22, 3 }
   0xe   : > { %s745_s24 = scalar_select %p39_p6, %s659_s14, %s41_s19  }
   0xf   : > { %s754_s28 = scalar_lea.hbm %s948_s0, %s403_s23  ;;  %p756_p7 = pnand %p441_p5, %p50_p4 }
  0x10   : > { %s177_s30 = scalar_lea.vmem [#allocation2], %s747_s25  ;;  %s763_s5 = scalar_lea.sflag [#allocation3], %s173_s21 }
  0x11   : > { %s185_s4 = sshll.u32 %s177_s30, 4  ;;  %s493_s6 = scalar_lea.hbm %s754_s28, 128  ;;  %s761_s4 = int_to_ptr.vmem [resolvable:$true] %s185_s4 }
  0x12   : > { %p494_p8 = scmp.ne.s32.totalorder %s754_s28, %s493_s6  ;;  %p495_p9 = pneg %p756_p7 }
  0x13   : > { %s498_s9 = scalar_lea.hbm %s948_s0, 256  ;;  %p499_p12 = scmp.lt.u32.totalorder %s754_s28, %s948_s0 }
  0x14   : > { %p496_p10 = pnand %p495_p9, %p494_p8  ;;  %p500_p13 = scmp.lt.u32.totalorder %s498_s9, %s493_s6 }
  0x15   : > { %p502_p2 = scmp.lt.u32.totalorder %s493_s6, %s754_s28 }
  0x16   : > { %p497_p11 = pneg %p496_p10  ;;  %p501_p0 = por %p500_p13, %p499_p12 }
  0x18   : > { %p503_p4 = por %p502_p2, %p501_p0 }
  0x1a   : > { %p504_p5 = pnand %p503_p4, %p497_p11 }
  0x1c   : > { %507 = shalt.err (!%p504_p5)
}
  0x1d   : > { %s508_s19 = scalar_lea.vmem %s761_s4, 128  ;;  %s673_s20 = smov [#allocation2]  }
  0x1e   : > { %p509_p6 = scmp.ne.s32.totalorder %s761_s4, %s508_s19  ;;  %s513_s21 = sshll.u32 %s673_s20, 4  ;;  %s514_s21 = int_to_ptr.vmem [resolvable:$false] %s513_s21 }
  0x1f   : > { %s515_s22 = scalar_lea.vmem %s514_s21, 256  ;;  %p516_p3 = scmp.lt.s32.totalorder %s761_s4, %s514_s21 }
  0x20   : > { %p511_p8 = pnand %p509_p6, %p495_p9  ;;  %p517_p12 = scmp.lt.s32.totalorder %s515_s22, %s508_s19 }
  0x22   : > { %p512_p10 = pneg %p511_p8  ;;  %p518_p13 = por %p517_p12, %p516_p3 }
  0x24   : > { %p519_p0 = pnand %p518_p13, %p512_p10 }
  0x26   : > { %522 = shalt.err (!%p519_p0)
}
  0x27   : > { %432 = dma.hbm_to_vmem [thread:$0]  (!%p756_p7), %s754_s28, 128, %s761_s4, %s763_s5  }
  0x28   : > { %s792_s26 = sadd.s32 4294967295, %s671_s17   ;;  %s398_s27 = sadd.s32 4294967294, %s671_s17  }
  0x29   : > { %p54_p3 = scmp.ne.s32.totalorder %s655_s13, %s651_s12  ;;  %p952_p11 = scmp.eq.s32.totalorder %s792_s26, 0 }
  0x2a   : > { %p134_p2 = scmp.eq.s32.totalorder %s792_s26, 1  ;;  %p140_p4 = scmp.eq.s32.totalorder %s398_s27, 1 }
  0x2b   : > { %p399_p5 = scmp.ge.s32.totalorder %s671_s17, 1  ;;  %p802_p6 = por %p952_p11, %p54_p3 }
  0x2c   : > { %p809_p8 = por %p134_p2, %p48_p1  ;;  %p813_p10 = por %p140_p4, %p54_p3 }
  0x2d   : > { %s958_s30 = scalar_select %p802_p6, 1, 0 }
  0x2e   : > { %s959_s28 = scalar_select %p809_p8, 1, 0 }
  0x2f   : > { %s960_s4 = scalar_select %p813_p10, 1, 0 }
  0x30   : > { %p147_p12 = scmp.lt.s32.totalorder %s671_s17, 3  ;;  %s823_s8 = scalar_lea.hbm %s950_s2, %s403_s23 }
  0x31   : > { %s674_s10 = smov [#allocation5]   ;;  %s196_s19 = scalar_lea.vmem [#allocation7], %s747_s25 }
  0x32   : > { %p825_p13 = pnand %p399_p5, %p147_p12  ;;  %s829_s11 = sshll.u32 %s674_s10, 4  ;;  %s163_s11 = int_to_ptr.vmem [resolvable:$true] %s829_s11 }
  0x33   : > { %s204_s20 = sshll.u32 %s196_s19, 4  ;;  %s523_s21 = scalar_lea.hbm %s823_s8, 128  ;;  %s205_s20 = int_to_ptr.vmem [resolvable:$true] %s204_s20 }
  0x34   : > { %s961_s9 = scalar_select %p825_p13, 1, 0 }
  0x35   : > { %p524_p0 = scmp.ne.s32.totalorder %s823_s8, %s523_s21  ;;  %s528_s27 = scalar_lea.hbm %s950_s2, 256 }
  0x36   : > { %p529_p4 = scmp.lt.u32.totalorder %s823_s8, %s950_s2  ;;  %p530_p5 = scmp.lt.u32.totalorder %s528_s27, %s523_s21 }
  0x37   : > { %p526_p3 = pnand %p524_p0, %p495_p9  ;;  %p532_p11 = scmp.lt.u32.totalorder %s523_s21, %s823_s8 }
  0x38   : > { %p531_p12 = por %p530_p5, %p529_p4 }
  0x39   : > { %p527_p2 = pneg %p526_p3 }
  0x3a   : > { %p533_p10 = por %p532_p11, %p531_p12 }
  0x3c   : > { %p534_p1 = pnand %p533_p10, %p527_p2 }
  0x3e   : > { %537 = shalt.err (!%p534_p1)
}
  0x3f   : > { %s538_s25 = scalar_lea.vmem %s205_s20, 128  ;;  %s675_s10 = smov [#allocation7]  }
  0x40   : > { %p539_p8 = scmp.ne.s32.totalorder %s205_s20, %s538_s25  ;;  %s543_s19 = sshll.u32 %s675_s10, 4  ;;  %s544_s19 = int_to_ptr.vmem [resolvable:$false] %s543_s19 }
  0x41   : > { %s545_s23 = scalar_lea.vmem %s544_s19, 256  ;;  %p546_p6 = scmp.lt.s32.totalorder %s205_s20, %s544_s19 }
  0x42   : > { %p541_p0 = pnand %p539_p8, %p495_p9  ;;  %p547_p13 = scmp.lt.s32.totalorder %s545_s23, %s538_s25 }
  0x44   : > { %p542_p3 = pneg %p541_p0  ;;  %p548_p4 = por %p547_p13, %p546_p6 }
  0x46   : > { %p549_p5 = pnand %p548_p4, %p542_p3 }
  0x48   : > { %552 = shalt.err (!%p549_p5)
}
  0x49   : > { %435 = dma.hbm_to_vmem [thread:$0]  (!%p756_p7), %s823_s8, 128, %s205_s20, %s763_s5  }
  0x4a   : > { %p962_p9 = scmp.eq.s32.totalorder %s792_s26, 0  ;;  %p963_p11 = scmp.ne.s32.totalorder %s961_s9, 0 }
  0x4b   : > { %s553_s6 = scalar_lea.hbm %s949_s1, 128 }
  0x4c   : > { %p964_p8 = pneg %p963_p11  ;;  %p554_p6 = scmp.ne.s32.totalorder %s949_s1, %s553_s6 }
  0x4d   : > { %p560_p2 = scmp.lt.u32.totalorder %s553_s6, %s949_s1 }
  0x4e   : > { %p860_p10 = pnand %p964_p8, %p962_p9 }
  0x50   : > { %p555_p13 = pneg %p860_p10 }
  0x52   : > { %p556_p7 = pnand %p555_p13, %p554_p6 }
  0x54   : > { %p557_p1 = pneg %p556_p7 }
  0x56   : > { %p562_p12 = pnand %p560_p2, %p557_p1 }
  0x58   : > { %565 = shalt.err (!%p562_p12)
}
  0x59   : > { %s566_s20 = scalar_lea.vmem %s163_s11, 128  ;;  %p574_p5 = scmp.lt.s32.totalorder %s163_s11, %s163_s11 }
  0x5a   : > { %p567_p0 = scmp.ne.s32.totalorder %s163_s11, %s566_s20  ;;  %p575_p9 = scmp.lt.s32.totalorder %s566_s20, %s566_s20 }
  0x5c   : > { %p569_p3 = pnand %p567_p0, %p555_p13  ;;  %p576_p8 = por %p575_p9, %p574_p5 }
  0x5e   : > { %p570_p4 = pneg %p569_p3 }
  0x60   : > { %p577_p11 = pnand %p576_p8, %p570_p4 }
  0x62   : > { %580 = shalt.err (!%p577_p11)
}
  0x63   : > { %428 = dma.hbm_to_vmem [thread:$0]  (!%p860_p10), %s949_s1, 128, %s163_s11, [#allocation6]  }
  0x64   : > { %p966_p6 = scmp.ne.s32.totalorder %s961_s9, 0 }
  0x65   : > { %s215_s19 = sand.u32 (!%p966_p6), 1, %s792_s26   ;;  %s217_s23 = sand.u32 (!%p966_p6), 1, %s655_s13  }
  0x66   : > { %213 = sbr.rel (%p966_p6) target bundleno = 142 (0x8e), region = 32  ;;  %s407_s22 = sshll.u32 (!%p966_p6), %s217_s23, 3 }
  0x67   : > { %s216_s27 = scalar_lea.sflag (!%p966_p6), [#allocation3], %s215_s19  ;;  %s219_s6 = scalar_lea.vmem (!%p966_p6), [#allocation2], %s407_s22 }
  0x68   : > { %p967_p13 = scmp.ne.s32.totalorder (!%p966_p6), %s958_s30, 0 }
  0x6d   : > { %634 = dma.done.wait (%p967_p13), %s216_s27, 128  }
  0x6e   : > { %636 = vsyncadd (%p967_p13), %s216_s27, 4294967168  ;;  %p968_p11 = scmp.eq.s32.totalorder %s792_s26, 0 }
  0x70   : > { %638 = dma.done.wait (%p968_p11), [#allocation6], 128   ;;  %p969_p10 = pmov %p968_p11 }
  0x71   : > { %s232_s9 = scalar_lea.vmem [#allocation7], %s407_s22 }
  0x72   : > { %640 = vsyncadd (%p969_p10), [#allocation6], 4294967168 }
  0x73   : > { %642 = dma.done.wait (%p967_p13), %s216_s27, 128  }
  0x74   : > { %644 = vsyncadd (%p967_p13), %s216_s27, 4294967168  ;;  %v260_v0 = vld [vmem:[%s219_s6] sm:$0xff]  ;;  %v261_v1 = vld [vmem:[#allocation5] sm:$0xff]  ;;  %s259_s11 = scalar_lea.vmem [#allocation8], %s407_s22  ;;  %s412_s29 = sshll.u32 %s663_s15, 7  ;;  %vm267_vm1 = vcmask 261120  }
  0x75   : > { %v263_v2 = vld [vmem:[%s232_s9] sm:$0xff]  ;;  %v262_v3 = vadd.f32 %v261_v1, %v260_v0  ;;  %s284_s21 = sshll.u32 %s259_s11, 4  ;;  %s902_s30 = scalar_lea.hbm %s951_s3, %s412_s29  ;;  %s897_s21 = int_to_ptr.vmem [resolvable:$true] %s284_s21 }
  0x76   : > { %vm264_vm0 = vcmp.ge.s32.totalorder %v263_v2, 2576980378  ;;  %s270_s5 = scalar_lea.sflag [#allocation4], %s217_s23  ;;  %s581_s8 = scalar_lea.vmem %s897_s21, 128 }
  0x77   : > { %v265_v4 = vmul.f32 1.1111112, %v262_v3  ;;  %p582_p7 = scmp.ne.s32.totalorder %s897_s21, %s581_s8  ;;  %p970_p1 = scmp.ne.s32.totalorder %s959_s28, 0 }
  0x78   : > { %s676_s15 = smov [#allocation8]  }
  0x79   : > { %v266_v5 = vsel %vm264_vm0, %v265_v4, 0.0  ;;  %p583_p2 = pnand %p582_p7, %p970_p1  ;;  %s585_s20 = sshll.u32 %s676_s15, 4  ;;  %s586_s20 = int_to_ptr.vmem [resolvable:$false] %s585_s20 }
  0x7a   : > { %268 = vst.msk [vmem:[%s259_s11] sm:$0xff] %vm267_vm1, %v266_v5  ;;  %s587_s25 = scalar_lea.vmem %s586_s20, 256  ;;  %p588_p0 = scmp.lt.s32.totalorder %s897_s21, %s586_s20 }
  0x7b   : > { %p584_p12 = pneg %p583_p2  ;;  %p589_p3 = scmp.lt.s32.totalorder %s587_s25, %s581_s8 }
  0x7d   : > { %p590_p4 = por %p589_p3, %p588_p0 }
  0x7f   : > { %p591_p5 = pnand %p590_p4, %p584_p12 }
  0x81   : > { %594 = shalt.err (!%p591_p5)
}
  0x82   : > { %s595_s10 = scalar_lea.hbm %s902_s30, 128  ;;  %s599_s22 = scalar_lea.hbm %s951_s3, 256 }
  0x83   : > { %p596_p9 = scmp.ne.s32.totalorder %s902_s30, %s595_s10  ;;  %p600_p13 = scmp.lt.u32.totalorder %s902_s30, %s951_s3 }
  0x84   : > { %p601_p11 = scmp.lt.u32.totalorder %s599_s22, %s595_s10  ;;  %p603_p7 = scmp.lt.u32.totalorder %s595_s10, %s902_s30 }
  0x85   : > { %p597_p8 = pnand %p596_p9, %p970_p1 }
  0x86   : > { %p602_p10 = por %p601_p11, %p600_p13 }
  0x87   : > { %p598_p6 = pneg %p597_p8 }
  0x88   : > { %p604_p2 = por %p603_p7, %p602_p10 }
  0x8a   : > { %p605_p12 = pnand %p604_p2, %p598_p6 }
  0x8c   : > { %608 = shalt.err (!%p605_p12)
}
  0x8d   : > { %423 = dma.vmem_to_hbm [thread:$0]  (%p970_p1), %s897_s21, 128, %s902_s30, %s270_s5  }
  0x8e PF: > { %s296_s9 = sand.u32 1, %s651_s12   ;;  %p971_p0 = scmp.ne.s32.totalorder %s960_s4, 0 }
  0x8f   : > { %p972_p3 = scmp.ge.s32.totalorder %s671_s17, 2  ;;  %s297_s11 = scalar_lea.sflag [#allocation4], %s296_s9 }
  0x91   : > { %p437_p4 = pnand %p972_p3, %p971_p0 }
  0x93   : > { %646 = dma.done.wait (!%p437_p4), %s297_s11, 128  }
  0x94   : > { %648 = vsyncadd (!%p437_p4), %s297_s11, 4294967168  ;;  %s20_s17 = sadd.s32 1, %s671_s17   ;;  %s973_s12 = smov %s655_s13 }
  0x95   : > { %p17_p5 = scmp.ge.s32.totalorder %s20_s17, 4   ;;  %s974_s13 = smov %s659_s14 }
  0x96   : > { %s975_s14 = smov %s745_s24  ;;  %s976_s15 = smov %s667_s16 }
  0x97   : > { %s977_s16 = smov %s979_s18  ;;  %19 = sbr.rel (!%p17_p5) target bundleno = 7 (0x7), region = 93 }
  0x9e   :  { %302 = vsyncpa [#allocation3], 1 }
  0x9f   :  { %304 = vsyncpa [#allocation3 + $0x1], 1 }
  0xa0   :  { %305 = vsyncpa [#allocation6], 1 }
  0xa1   :  { %306 = vsyncpa [#allocation4], 1 }
  0xa2   :  { %308 = vsyncpa [#allocation4 + $0x1], 1 }

</bundles_post_ra>
